<compile_context>
chip_gen: v5e
topology: v5e:2x2
jax: 0.10.0
libtpu: 0.0.40
codegen_flags: <defaults>
</compile_context>

<pallas_src>
import jax
import jax.numpy as jnp
from jax.experimental import pallas as pl
from jax.experimental.pallas import tpu as pltpu


def _round_up(x, m):
    return ((x + m - 1) // m) * m


def _round_down(x, m):
    return (x // m) * m


def _vmem_capacity_bytes():
    """Physical VMEM of the local chip; conservative 64 MiB fallback (v7x)."""
    try:
        info = pltpu.get_tpu_info()
        cap = getattr(info, "vmem_capacity_bytes", None)
        if cap:
            return int(cap)
    except Exception:
        pass
    return 64 * 1024 * 1024


def _axis_semantics(num_batch_tiles):
    """Batch/reduction dimension semantics.

    On v7x (2 TensorCores per chip) use CORE_PARALLEL so the batch grid axis
    is actually sharded across both cores' HBM paths (plain "parallel" is a
    near no-op for codegen).  Everywhere else fall back to plain strings.
    """
    try:
        kind = jax.devices()[0].device_kind.lower()
    except Exception:
        kind = ""
    is_v7 = ("v7" in kind) or ("7x" in kind)
    if is_v7 and num_batch_tiles >= 2 and hasattr(pltpu, "CORE_PARALLEL"):
        return (pltpu.CORE_PARALLEL, pltpu.ARBITRARY)
    return ("parallel", "arbitrary")


def _choose_tiles(B, D, itemsize, budget_bytes):
    """Pick (tile_b, tile_d) so one streamed x buffer is ~2-4 MiB and two
    buffers (double-buffering) fit in `budget_bytes`."""
    target = min(4 * 1024 * 1024, max(budget_bytes // 2, 128 * 128 * itemsize))
    row_bytes = D * itemsize
    if 128 * row_bytes <= target:
        # Full-D tiles: a single reduction step per batch tile.
        tile_d = D
        tile_b = _round_down(target // row_bytes, 128)
        tile_b = max(128, min(tile_b, 4096, _round_up(B, 128)))
    else:
        # Very large D: also tile the reduction axis (accumulator path), so
        # VMEM is bounded no matter how big D gets (critical on v7x's 64 MiB).
        tile_b = min(_round_up(B, 128), 512)
        tile_d = _round_down(target // (tile_b * itemsize), 128)
        tile_d = max(128, min(tile_d, _round_up(D, 128)))
    return tile_b, tile_d


def _make_kernel(D, tile_d):
    mask_d = (D % tile_d) != 0

    def kernel(x_ref, w_ref, b_ref, o_ref, acc_ref):
        # x_ref:   (tile_b, tile_d) VMEM, streamed per grid step
        # w_ref:   (1, tile_d)      VMEM, resident along the batch axis
        # b_ref:   (1,)             SMEM scalar bias
        # o_ref:   (1, tile_b)      VMEM lane-dense output slab
        # acc_ref: (1, tile_b)      f32 accumulator scratch
        k = pl.program_id(1)

        @pl.when(k == 0)
        def _init():
            acc_ref[...] = jnp.zeros_like(acc_ref)

        x = x_ref[...].astype(jnp.float32)
        w = w_ref[...].astype(jnp.float32)          # (1, tile_d) broadcasts
        prod = x * w
        if mask_d:
            # Ragged last D tile: zero out-of-range columns so boundary-DMA
            # garbage never reaches the accumulator.
            col = jax.lax.broadcasted_iota(jnp.int32, prod.shape, 1) + k * tile_d
            prod = jnp.where(col < D, prod, 0.0)

        # VPU multiply + lane reduction (f32 accumulate).  Avoids a wasteful
        # 1-output-column MXU matmul and the (1, D) weight-row transpose.
        acc_ref[...] += jnp.sum(prod, axis=-1).reshape(1, -1)

        @pl.when(k == pl.num_programs(1) - 1)
        def _finish():
            logits = acc_ref[...] + b_ref[0]
            # exp on EUP; f32: very negative logits give inf -> prob 0.0 (no NaN).
            o_ref[...] = (1.0 / (1.0 + jnp.exp(-logits))).astype(o_ref.dtype)

    return kernel


def linear_layer_forward(x, weight, bias, *, tile_b=None, tile_d=None,
                         vmem_limit_bytes=None):
    """Pallas equivalent of LinearLayer.forward.

    x:      (B, D)  activations (f32 or bf16 -- feed bf16 when upstream
                    precision allows: HBM bytes for x are the whole cost here;
                    accumulation is f32 in-kernel regardless)
    weight: (1, D)  PyTorch nn.Linear layout (out_features, in_features)
    bias:   (1,)
    returns (B, 1)  float32 probabilities

    Optional tile overrides must be multiples of 128.
    """
    B, D = x.shape
    assert weight.shape == (1, D), weight.shape
    assert bias.shape == (1,), bias.shape

    itemsize = jnp.dtype(x.dtype).itemsize

    # Per-generation VMEM budget: 3/4 of physical, capped at 96 MiB
    # (-> ~48 MiB on v7x's 64 MiB, 96 MiB on v5e/v6e's 128 MiB).
    if vmem_limit_bytes is None:
        vmem_limit_bytes = min(96 * 1024 * 1024, (_vmem_capacity_bytes() * 3) // 4)
    budget = vmem_limit_bytes // 2   # headroom for weight / output / acc buffers

    auto_b, auto_d = _choose_tiles(B, D, itemsize, budget)
    tile_b = auto_b if tile_b is None else tile_b
    tile_d = auto_d if tile_d is None else tile_d

    nb = pl.cdiv(B, tile_b)   # no padding of x: ragged last batch tile
    nd = pl.cdiv(D, tile_d)   # ragged last D tile masked in-kernel

    dim_sem = _axis_semantics(nb)

    out = pl.pallas_call(
        _make_kernel(D, tile_d),
        out_shape=jax.ShapeDtypeStruct((1, nb * tile_b), jnp.float32),
        grid=(nb, nd),
        in_specs=[
            pl.BlockSpec((tile_b, tile_d), lambda i, k: (i, k)),     # streamed x
            pl.BlockSpec((1, tile_d), lambda i, k: (0, k)),          # weight row
            pl.BlockSpec(memory_space=pltpu.MemorySpace.SMEM),       # scalar bias
        ],
        out_specs=pl.BlockSpec((1, tile_b), lambda i, k: (0, i)),    # lane-dense
        scratch_shapes=[pltpu.VMEM((1, tile_b), jnp.float32)],       # f32 acc
        compiler_params=pltpu.CompilerParams(
            dimension_semantics=dim_sem,
            vmem_limit_bytes=int(vmem_limit_bytes),
        ),
    )(x, weight, bias)

    # Boundary batch tiles computed on garbage rows; those lanes are discarded.
    return out[0, :B].reshape(B, 1)


if __name__ == "__main__":
    feature_dim = 32
    num_frames = 8
    batch = 2
    D = feature_dim * num_frames   # 256

    key = jax.random.PRNGKey(0)
    kx, kw, kb, kx2, kw2, kb2 = jax.random.split(key, 6)

    # Deterministic parameter init (synthetic; mimics a small uniform init).
    bound = 1.0 / (D ** 0.5)
    weight = jax.random.uniform(kw, (1, D), jnp.float32, -bound, bound)
    bias = jax.random.uniform(kb, (1,), jnp.float32, -bound, bound)
    x = jax.random.normal(kx, (batch, D), jnp.float32)

    prob = jax.block_until_ready(linear_layer_forward(x, weight, bias))
    ref = jax.nn.sigmoid(x @ weight.T + bias)
    assert prob.shape == (batch, 1)
    assert jnp.allclose(prob, ref, atol=1e-5), (prob, ref)

    # Also exercise the D-tiled accumulator path with ragged batch and D tiles.
    B2, D2 = 5, 320
    w2 = jax.random.uniform(kw2, (1, D2), jnp.float32, -0.05, 0.05)
    b2 = jax.random.uniform(kb2, (1,), jnp.float32, -0.05, 0.05)
    x2 = jax.random.normal(kx2, (B2, D2), jnp.float32)
    prob2 = jax.block_until_ready(
        linear_layer_forward(x2, w2, b2, tile_b=128, tile_d=128))
    ref2 = jax.nn.sigmoid(x2 @ w2.T + b2)
    assert prob2.shape == (B2, 1)
    assert jnp.allclose(prob2, ref2, atol=1e-5), (prob2, ref2)

    print("KERNEL_OK")
</pallas_src>

<mosaic_0001>
module attributes {stable_mosaic.version = 11 : i64} {
  func.func @kernel(%arg0: i32, %arg1: i32, %arg2: memref<128x256xf32, #tpu.memory_space<vmem>>, %arg3: memref<1x256xf32, #tpu.memory_space<vmem>>, %arg4: memref<1xf32, #tpu.memory_space<smem>>, %arg5: memref<1x128xf32, #tpu.memory_space<vmem>>, %arg6: memref<1x128xf32, #tpu.memory_space<vmem>>) attributes {dimension_semantics = [#tpu.dimension_semantics<parallel>, #tpu.dimension_semantics<arbitrary>], iteration_bounds = array<i64: 1, 1>, scalar_prefetch = 0 : i64, scratch_operands = 1 : i64, tpu.core_type = #tpu.core_type<tc>, window_params = [{transform_indices = @transform_0, window_bounds = array<i64: 128, 256>}, {transform_indices = @transform_1, window_bounds = array<i64: 1, 256>}, {transform_indices = @transform_2, window_bounds = array<i64: 1>}, {transform_indices = @transform_3, window_bounds = array<i64: 1, 128>}]} {
    %c0_i32 = arith.constant 0 : i32
    %0 = arith.cmpi eq, %arg1, %c0_i32 : i32
    %1 = arith.extui %0 : i1 to i32
    %c0_i32_0 = arith.constant 0 : i32
    %2 = arith.cmpi ne, %1, %c0_i32_0 : i32
    scf.if %2 {
      %cst_10 = arith.constant 0.000000e+00 : f32
      %15 = vector.broadcast %cst_10 : f32 to vector<1x128xf32>
      %c0_11 = arith.constant 0 : index
      %c0_12 = arith.constant 0 : index
      %16 = vector.load %arg6[%c0_11, %c0_12] : memref<1x128xf32, #tpu.memory_space<vmem>>, vector<1x128xf32>
      tpu.vector_store %arg6[%c0_11, %c0_12], %15 {strides = array<i32>} : memref<1x128xf32, #tpu.memory_space<vmem>>, vector<1x128xf32>,
    } else {
    }
    %c0 = arith.constant 0 : index
    %c0_1 = arith.constant 0 : index
    %3 = vector.load %arg2[%c0, %c0_1] : memref<128x256xf32, #tpu.memory_space<vmem>>, vector<128x256xf32>
    %c0_2 = arith.constant 0 : index
    %c0_3 = arith.constant 0 : index
    %4 = vector.load %arg3[%c0_2, %c0_3] : memref<1x256xf32, #tpu.memory_space<vmem>>, vector<1x256xf32>
    %5 = vector.broadcast %4 : vector<1x256xf32> to vector<128x256xf32>
    %6 = arith.mulf %3, %5 : vector<128x256xf32>
    %c0_4 = arith.constant 0 : index
    %c0_5 = arith.constant 0 : index
    %7 = vector.load %arg6[%c0_4, %c0_5] : memref<1x128xf32, #tpu.memory_space<vmem>>, vector<1x128xf32>
    %cst = arith.constant dense<0.000000e+00> : vector<128xf32>
    %8 = vector.multi_reduction <add>, %6, %cst [1] : vector<128x256xf32> to vector<128xf32>
    %9 = vector.shape_cast %8 : vector<128xf32> to vector<1x128xf32>
    %10 = arith.addf %7, %9 : vector<1x128xf32>
    %c0_6 = arith.constant 0 : index
    %c0_7 = arith.constant 0 : index
    %11 = vector.load %arg6[%c0_6, %c0_7] : memref<1x128xf32, #tpu.memory_space<vmem>>, vector<1x128xf32>
    tpu.vector_store %arg6[%c0_6, %c0_7], %10 {strides = array<i32>} : memref<1x128xf32, #tpu.memory_space<vmem>>, vector<1x128xf32>,
    %c0_i32_8 = arith.constant 0 : i32
    %12 = arith.cmpi eq, %arg1, %c0_i32_8 : i32
    %13 = arith.extui %12 : i1 to i32
    %c0_i32_9 = arith.constant 0 : i32
    %14 = arith.cmpi ne, %13, %c0_i32_9 : i32
    scf.if %14 {
      %c0_10 = arith.constant 0 : index
      %c0_11 = arith.constant 0 : index
      %15 = vector.load %arg6[%c0_10, %c0_11] : memref<1x128xf32, #tpu.memory_space<vmem>>, vector<1x128xf32>
      %c0_12 = arith.constant 0 : index
      %16 = memref.load %arg4[%c0_12] : memref<1xf32, #tpu.memory_space<smem>>
      %17 = vector.broadcast %16 : f32 to vector<1x128xf32>
      %18 = arith.addf %15, %17 : vector<1x128xf32>
      %cst_13 = arith.constant 0.000000e+00 : f32
      %19 = vector.broadcast %cst_13 : f32 to vector<1x128xf32>
      %20 = arith.subf %19, %18 : vector<1x128xf32>
      %21 = math.exp %20 : vector<1x128xf32>
      %cst_14 = arith.constant 1.000000e+00 : f32
      %22 = vector.broadcast %cst_14 : f32 to vector<1x128xf32>
      %23 = arith.addf %22, %21 : vector<1x128xf32>
      %cst_15 = arith.constant 1.000000e+00 : f32
      %24 = vector.broadcast %cst_15 : f32 to vector<1x128xf32>
      %25 = arith.divf %24, %23 : vector<1x128xf32>
      %c0_16 = arith.constant 0 : index
      %c0_17 = arith.constant 0 : index
      %26 = vector.load %arg5[%c0_16, %c0_17] : memref<1x128xf32, #tpu.memory_space<vmem>>, vector<1x128xf32>
      tpu.vector_store %arg5[%c0_16, %c0_17], %25 {strides = array<i32>} : memref<1x128xf32, #tpu.memory_space<vmem>>, vector<1x128xf32>,
    } else {
    }
    return
  }
  func.func @transform_0(%arg0: i32, %arg1: i32) -> (i32, i32) {
    %c0_i32 = arith.constant 0 : i32
    return %arg0, %arg1 : i32, i32
  }
  func.func @transform_1(%arg0: i32, %arg1: i32) -> (i32, i32) {
    %c0_i32 = arith.constant 0 : i32
    %c0_i32_0 = arith.constant 0 : i32
    return %c0_i32, %arg1 : i32, i32
  }
  func.func @transform_2(%arg0: i32, %arg1: i32) -> i32 {
    %c0_i32 = arith.constant 0 : i32
    %c0_i32_0 = arith.constant 0 : i32
    return %c0_i32 : i32
  }
  func.func @transform_3(%arg0: i32, %arg1: i32) -> (i32, i32) {
    %c0_i32 = arith.constant 0 : i32
    %c0_i32_0 = arith.constant 0 : i32
    return %c0_i32, %arg0 : i32, i32
  }
}

</mosaic_0001>

<bundles_post_ra>
// kernel: tpu_custom_call.1
= control target key start
LH: loop header
LB: loop body
LE: loop exit
PB: predicated region body
PF: predicated region fallthrough
CT: control target
= control target key end

     0   :  { %9 = vsyncpa [#allocation5], 0  ;;  %s1079_s0 = inlined_call_operand.hbm [shape: f32[2,256], index: 0, kind: input, shape index: {}]   ;;  %s1080_s1 = inlined_call_operand.vmem [shape: f32[1,256], index: 1, kind: input, shape index: {}]   ;;  %s1081_s2 = inlined_call_operand.<no memory space> [shape: f32[1], index: 2, kind: input, shape index: {}]   ;;  %s1082_s3 = inlined_call_operand.hbm [shape: f32[1,128], index: 3, kind: output, shape index: {}]  }
   0x1   :  { %10 = vsyncpa [#allocation6], 0 }
   0x2   :  { %14 = vsyncadd [#allocation5], 4032  ;;  %s15_s14 = sshll.u32 %s1079_s0, 4  ;;  %s951_s15 = smov [#allocation4]   ;;  %s16_s14 = int_to_ptr.hbm [resolvable:$true] %s15_s14 }
   0x3   :  { %s17_s16 = sshll.u32 %s951_s15, 4  ;;  %s952_s17 = smov 64   ;;  %s18_s16 = int_to_ptr.vmem [resolvable:$true] %s17_s16 }
   0x4   :  { %s953_s18 = smov 4  }
   0x5   :  { %23 = dma.hbm_to_vmem [thread:$0]  %s16_s14, 64, %s18_s16, [#allocation5], %s952_s17, %s952_s17, %s953_s18  }
   0x6   :  { %947 = dma.done.wait [#allocation5], 4096  }
   0x7   :  { %948 = vsyncadd [#allocation5], 4294963200  ;;  %v101_v0 = vld [vmem:[%s1080_s1] sm:$0x3]  ;;  %vm106_vm0 = vcmask 1041408   ;;  %vm108_vm1 = vcmask 1043458  }
   0x8   :  { %v103_v1 = vperm.slane %v101_v0, 0  ;;  %v104_v2 = vperm.slane %v101_v0, 1  ;;  %vm111_vm2 = vcmask 1045508   ;;  %vm114_vm3 = vcmask 1045504   ;;  %v37_v3 = vld [vmem:[#allocation4] sm:$0xf] }
   0x9   :  { %v41_v5 = vld [vmem:[#allocation4 + $0x10] sm:$0xf]  ;;  %v38_v6 = vld [vmem:[#allocation4 + $0x4] sm:$0xf]  ;;  %v39_v7 = vld [vmem:[#allocation4 + $0x8] sm:$0xf] }
   0xa   :  { %v105_v4 = vrot.slane %v104_v2, 6  ;;  %v40_v8 = vld [vmem:[#allocation4 + $0xc] sm:$0xf]  ;;  %v42_v17 = vld [vmem:[#allocation4 + $0x14] sm:$0xf]  ;;  %vm781_vm4 = vcmask 130112  }
   0xb   :  { %v43_v18 = vld [vmem:[#allocation4 + $0x18] sm:$0xf]  ;;  %v44_v23 = vld [vmem:[#allocation4 + $0x1c] sm:$0xf]  ;;  %v45_v27 = vld [vmem:[#allocation4 + $0x20] sm:$0xf] }
   0xc   :  { %v983_v9 = vsel %vm106_vm0, %v103_v1, %v105_v4  ;;  %v109_v10 = vsel %vm108_vm1, %v103_v1, %v105_v4  ;;  %v112_v11 = vsel %vm111_vm2, %v103_v1, %v105_v4  ;;  %v115_v12 = vsel %vm114_vm3, %v105_v4, %v103_v1  ;;  %v46_v28 = vld [vmem:[#allocation4 + $0x24] sm:$0xf]  ;;  %v47_v29 = vld [vmem:[#allocation4 + $0x28] sm:$0xf]  ;;  %v48_v31 = vld [vmem:[#allocation4 + $0x2c] sm:$0xf] }
   0xd   :  { %v985_v13 = vrot.slane %v109_v10, 2  ;;  %v987_v14 = vrot.slane %v112_v11, 4  ;;  %v989_v15 = vrot.slane %v115_v12, 6  ;;  %v121_v16 = vmul.f32 %v983_v9, %v37_v3  ;;  %v49_v33 = vld [vmem:[#allocation4 + $0x30] sm:$0xf]  ;;  %s956_s21 = smov [#allocation7]  }
   0xe   :  { %v125_v19 = vmul.f32 %v983_v9, %v41_v5  ;;  %v129_v30 = vmul.f32 %v983_v9, %v45_v27  ;;  %v50_v34 = vld [vmem:[#allocation4 + $0x34] sm:$0xf]  ;;  %v51_v40 = vld [vmem:[#allocation4 + $0x38] sm:$0xf]  ;;  %v52_v41 = vld [vmem:[#allocation4 + $0x3c] sm:$0xf]  ;;  %v133_v42 = vmul.f32 %v983_v9, %v49_v33 }
   0xf   :  { %v122_v20 = vmul.f32 %v985_v13, %v38_v6  ;;  %v123_v21 = vmul.f32 %v987_v14, %v39_v7  ;;  %v124_v22 = vmul.f32 %v989_v15, %v40_v8  ;;  %250 = vst [vmem:[#allocation1] ss:$4 sm:$0xff] %v121_v16  ;;  %v126_v24 = vmul.f32 %v985_v13, %v42_v17  ;;  %v53_v48 = vld [vmem:[#allocation4 + $0x40] sm:$0xf]  ;;  %v54_v50 = vld [vmem:[#allocation4 + $0x44] sm:$0xf] }
  0x10   :  { %258 = vst [vmem:[#allocation1 + $0x20] ss:$4 sm:$0xff] %v125_v19  ;;  %v127_v25 = vmul.f32 %v987_v14, %v43_v18  ;;  %v128_v26 = vmul.f32 %v989_v15, %v44_v23  ;;  %v130_v32 = vmul.f32 %v985_v13, %v46_v28  ;;  %v131_v37 = vmul.f32 %v987_v14, %v47_v29  ;;  %v55_v51 = vld [vmem:[#allocation4 + $0x48] sm:$0xf]  ;;  %v56_v53 = vld [vmem:[#allocation4 + $0x4c] sm:$0xf] }
  0x11   :  { %252 = vst [vmem:[#allocation1 + $0x1] ss:$4 sm:$0xff] %v122_v20  ;;  %v132_v39 = vmul.f32 %v989_v15, %v48_v31  ;;  %v134_v44 = vmul.f32 %v985_v13, %v50_v34  ;;  %v135_v46 = vmul.f32 %v987_v14, %v51_v40  ;;  %v136_v47 = vmul.f32 %v989_v15, %v52_v41  ;;  %v57_v56 = vld [vmem:[#allocation4 + $0x50] sm:$0xf]  ;;  %v58_v57 = vld [vmem:[#allocation4 + $0x54] sm:$0xf] }
  0x12   :  { %254 = vst [vmem:[#allocation1 + $0x2] ss:$4 sm:$0xff] %v123_v21  ;;  %v137_v52 = vmul.f32 %v983_v9, %v53_v48  ;;  %v138_v54 = vmul.f32 %v985_v13, %v54_v50  ;;  %v139_v55 = vmul.f32 %v987_v14, %v55_v51  ;;  %v140_v61 = vmul.f32 %v989_v15, %v56_v53  ;;  %v59_v62 = vld [vmem:[#allocation4 + $0x58] sm:$0xf]  ;;  %v60_v63 = vld [vmem:[#allocation4 + $0x5c] sm:$0xf] }
  0x13   :  { %256 = vst [vmem:[#allocation1 + $0x3] ss:$4 sm:$0xff] %v124_v22  ;;  %v141_v0 = vmul.f32 %v983_v9, %v57_v56  ;;  %v142_v1 = vmul.f32 %v985_v13, %v58_v57  ;;  %v143_v4 = vmul.f32 %v987_v14, %v59_v62  ;;  %v144_v5 = vmul.f32 %v989_v15, %v60_v63  ;;  %v61_v6 = vld [vmem:[#allocation4 + $0x60] sm:$0xf]  ;;  %v62_v8 = vld [vmem:[#allocation4 + $0x64] sm:$0xf] }
  0x14   :  { %260 = vst [vmem:[#allocation1 + $0x21] ss:$4 sm:$0xff] %v126_v24  ;;  %v63_v10 = vld [vmem:[#allocation4 + $0x68] sm:$0xf]  ;;  %v145_v11 = vmul.f32 %v983_v9, %v61_v6  ;;  %v64_v12 = vld [vmem:[#allocation4 + $0x6c] sm:$0xf]  ;;  %v146_v16 = vmul.f32 %v985_v13, %v62_v8 }
  0x15   :  { %262 = vst [vmem:[#allocation1 + $0x22] ss:$4 sm:$0xff] %v127_v25  ;;  %v147_v17 = vmul.f32 %v987_v14, %v63_v10  ;;  %v65_v18 = vld [vmem:[#allocation4 + $0x70] sm:$0xf]  ;;  %v66_v19 = vld [vmem:[#allocation4 + $0x74] sm:$0xf]  ;;  %v148_v23 = vmul.f32 %v989_v15, %v64_v12 }
  0x16   :  { %264 = vst [vmem:[#allocation1 + $0x23] ss:$4 sm:$0xff] %v128_v26  ;;  %v67_v24 = vld [vmem:[#allocation4 + $0x78] sm:$0xf]  ;;  %v68_v25 = vld [vmem:[#allocation4 + $0x7c] sm:$0xf]  ;;  %v149_v26 = vmul.f32 %v983_v9, %v65_v18  ;;  %v150_v27 = vmul.f32 %v985_v13, %v66_v19 }
  0x17   :  { %v152_v31 = vmul.f32 %v989_v15, %v68_v25  ;;  %v70_v34 = vld [vmem:[#allocation4 + $0x84] sm:$0xf]  ;;  %v73_v40 = vld [vmem:[#allocation4 + $0x90] sm:$0xf]  ;;  %v74_v41 = vld [vmem:[#allocation4 + $0x94] sm:$0xf] }
  0x18   :  { %v157_v48 = vmul.f32 %v983_v9, %v73_v40  ;;  %v78_v56 = vld [vmem:[#allocation4 + $0xa4] sm:$0xf]  ;;  %v79_v57 = vld [vmem:[#allocation4 + $0xa8] sm:$0xf]  ;;  %v81_v62 = vld [vmem:[#allocation4 + $0xb0] sm:$0xf] }
  0x19   :  { %v82_v63 = vld [vmem:[#allocation4 + $0xb4] sm:$0xf]  ;;  %v165_v6 = vmul.f32 %v983_v9, %v81_v62  ;;  %v86_v18 = vld [vmem:[#allocation4 + $0xc4] sm:$0xf]  ;;  %v87_v19 = vld [vmem:[#allocation4 + $0xc8] sm:$0xf] }
  0x1a   :  { %v265_v35 = vld.sshfl [vmem:[#allocation1] sm:$0xff pattern:$0x73625140]  ;;  %v266_v36 = vld.sshfl [vmem:[#allocation1 + $0x8] sm:$0xff pattern:$0x73625140] }
  0x1b   :  { %v385_v38 = vadd.f32 %v266_v36, %v265_v35  ;;  %269 = vst [vmem:[#allocation1] ss:$4 sm:$0xff] %v129_v30  ;;  %v151_v30 = vmul.f32 %v987_v14, %v67_v24  ;;  %v71_v35 = vld [vmem:[#allocation4 + $0x88] sm:$0xf]  ;;  %v89_v24 = vld [vmem:[#allocation4 + $0xd0] sm:$0xf] }
  0x1c   :  { %270 = vst [vmem:[#allocation1 + $0x1] ss:$4 sm:$0xff] %v130_v32  ;;  %v69_v32 = vld [vmem:[#allocation4 + $0x80] sm:$0xf]  ;;  %v90_v25 = vld [vmem:[#allocation4 + $0xd4] sm:$0xf] }
  0x1d   :  { %386 = vadd.xlane.f32.xlu0 %v385_v38  ;;  %v267_v43 = vld.sshfl [vmem:[#allocation1 + $0x20] sm:$0xff pattern:$0x73625140]  ;;  %v268_v45 = vld.sshfl [vmem:[#allocation1 + $0x28] sm:$0xff pattern:$0x73625140]  ;;  %v153_v36 = vmul.f32 %v983_v9, %v69_v32  ;;  %v154_v38 = vmul.f32 %v985_v13, %v70_v34  ;;  %v173_v32 = vmul.f32 %v983_v9, %v89_v24 }
  0x1e   :  { %271 = vst [vmem:[#allocation1 + $0x2] ss:$4 sm:$0xff] %v131_v37  ;;  %v388_v49 = vadd.f32 %v268_v45, %v267_v43  ;;  %v72_v37 = vld [vmem:[#allocation4 + $0x8c] sm:$0xf]  ;;  %v94_v40 = vld [vmem:[#allocation4 + $0xe4] sm:$0xf] }
  0x1f   :  { %272 = vst [vmem:[#allocation1 + $0x3] ss:$4 sm:$0xff] %v132_v39  ;;  %v155_v39 = vmul.f32 %v987_v14, %v71_v35  ;;  %v156_v45 = vmul.f32 %v989_v15, %v72_v37  ;;  %vm785_vm5 = vcmask 195712   ;;  %vm789_vm6 = vcmask 261312   ;;  %s874_s22 = sshll.u32 %s956_s21, 4  ;;  %s875_s22 = int_to_ptr.vmem [resolvable:$true] %s874_s22 }
  0x20   :  { %273 = vst [vmem:[#allocation1 + $0x20] ss:$4 sm:$0xff] %v133_v42  ;;  %vm793_vm7 = vcmask 326912   ;;  %vm797_vm8 = vcmask 392512   ;;  %vm801_vm9 = vcmask 458112   ;;  %vm805_vm10 = vcmask 523712  }
  0x21   :  { %274 = vst [vmem:[#allocation1 + $0x21] ss:$4 sm:$0xff] %v134_v44  ;;  %vm809_vm11 = vcmask 589312   ;;  %vm813_vm12 = vcmask 654912   ;;  %vm817_vm13 = vcmask 720512   ;;  %vm821_vm14 = vcmask 786112  }
  0x22   :  { %275 = vst [vmem:[#allocation1 + $0x22] ss:$4 sm:$0xff] %v135_v46  ;;  %v75_v46 = vld [vmem:[#allocation4 + $0x98] sm:$0xf]  ;;  %vm825_vm15 = vcmask 851712   ;;  %vm829_vm0 = vcmask 917312  }
  0x23   :  { %276 = vst [vmem:[#allocation1 + $0x23] ss:$4 sm:$0xff] %v136_v47  ;;  %v76_v47 = vld [vmem:[#allocation4 + $0x9c] sm:$0xf]  ;;  %vm833_vm1 = vcmask 982912   ;;  %vm837_vm2 = vcmask 1048512  }
  0x25   :  { %389 = vadd.xlane.f32.xlu0 %v388_v49  ;;  %v158_v49 = vmul.f32 %v985_v13, %v74_v41  ;;  %v95_v41 = vld [vmem:[#allocation4 + $0xe8] sm:$0xf] }
  0x26   :  { %v277_v58 = vld.sshfl [vmem:[#allocation1] sm:$0xff pattern:$0x73625140]  ;;  %v278_v59 = vld.sshfl [vmem:[#allocation1 + $0x8] sm:$0xff pattern:$0x73625140] }
  0x27   :  { %v391_v60 = vadd.f32 %v278_v59, %v277_v58  ;;  %281 = vst [vmem:[#allocation1] ss:$4 sm:$0xff] %v137_v52  ;;  %v159_v52 = vmul.f32 %v987_v14, %v75_v46  ;;  %v80_v59 = vld [vmem:[#allocation4 + $0xac] sm:$0xf]  ;;  %v97_v46 = vld [vmem:[#allocation4 + $0xf0] sm:$0xf] }
  0x28   :  { %282 = vst [vmem:[#allocation1 + $0x1] ss:$4 sm:$0xff] %v138_v54  ;;  %v160_v54 = vmul.f32 %v989_v15, %v76_v47  ;;  %v98_v47 = vld [vmem:[#allocation4 + $0xf4] sm:$0xf] }
  0x29   :  { %392 = vadd.xlane.f32.xlu1 %v391_v60  ;;  %283 = vst [vmem:[#allocation1 + $0x2] ss:$4 sm:$0xff] %v139_v55  ;;  %v77_v55 = vld [vmem:[#allocation4 + $0xa0] sm:$0xf]  ;;  %v162_v60 = vmul.f32 %v985_v13, %v78_v56 }
  0x2a   :  { %v279_v2 = vld.sshfl [vmem:[#allocation1 + $0x20] sm:$0xff pattern:$0x73625140]  ;;  %v280_v3 = vld.sshfl [vmem:[#allocation1 + $0x28] sm:$0xff pattern:$0x73625140]  ;;  %v161_v58 = vmul.f32 %v983_v9, %v77_v55  ;;  %v182_v55 = vmul.f32 %v985_v13, %v98_v47 }
  0x2b   :  { %284 = vst [vmem:[#allocation1 + $0x3] ss:$4 sm:$0xff] %v140_v61  ;;  %v394_v7 = vadd.f32 %v280_v3, %v279_v2  ;;  %v163_v61 = vmul.f32 %v987_v14, %v79_v57  ;;  %v164_v3 = vmul.f32 %v989_v15, %v80_v59 }
  0x2c   :  { %285 = vst [vmem:[#allocation1 + $0x20] ss:$4 sm:$0xff] %v141_v0 }
  0x2d   :  { %286 = vst [vmem:[#allocation1 + $0x21] ss:$4 sm:$0xff] %v142_v1 }
  0x2e   :  { %287 = vst [vmem:[#allocation1 + $0x22] ss:$4 sm:$0xff] %v143_v4  ;;  %v83_v4 = vld [vmem:[#allocation4 + $0xb8] sm:$0xf] }
  0x2f   :  { %288 = vst [vmem:[#allocation1 + $0x23] ss:$4 sm:$0xff] %v144_v5  ;;  %v84_v5 = vld [vmem:[#allocation4 + $0xbc] sm:$0xf] }
  0x31   :  { %395 = vadd.xlane.f32.xlu1 %v394_v7  ;;  %v166_v7 = vmul.f32 %v985_v13, %v82_v63 }
  0x32   :  { %v289_v20 = vld.sshfl [vmem:[#allocation1] sm:$0xff pattern:$0x73625140]  ;;  %v290_v21 = vld.sshfl [vmem:[#allocation1 + $0x8] sm:$0xff pattern:$0x73625140] }
  0x33   :  { %v397_v22 = vadd.f32 %v290_v21, %v289_v20  ;;  %293 = vst [vmem:[#allocation1] ss:$4 sm:$0xff] %v145_v11  ;;  %v167_v11 = vmul.f32 %v987_v14, %v83_v4  ;;  %v88_v21 = vld [vmem:[#allocation4 + $0xcc] sm:$0xf] }
  0x34   :  { %294 = vst [vmem:[#allocation1 + $0x1] ss:$4 sm:$0xff] %v146_v16  ;;  %v168_v16 = vmul.f32 %v989_v15, %v84_v5 }
  0x35   :  { %398 = vadd.xlane.f32.xlu2 %v397_v22  ;;  %295 = vst [vmem:[#allocation1 + $0x2] ss:$4 sm:$0xff] %v147_v17  ;;  %v85_v17 = vld [vmem:[#allocation4 + $0xc0] sm:$0xf]  ;;  %v170_v22 = vmul.f32 %v985_v13, %v86_v18 }
  0x36   :  { %v291_v28 = vld.sshfl [vmem:[#allocation1 + $0x20] sm:$0xff pattern:$0x73625140]  ;;  %v292_v29 = vld.sshfl [vmem:[#allocation1 + $0x28] sm:$0xff pattern:$0x73625140]  ;;  %v169_v20 = vmul.f32 %v983_v9, %v85_v17 }
  0x37   :  { %296 = vst [vmem:[#allocation1 + $0x3] ss:$4 sm:$0xff] %v148_v23  ;;  %v400_v33 = vadd.f32 %v292_v29, %v291_v28  ;;  %v171_v23 = vmul.f32 %v987_v14, %v87_v19  ;;  %v172_v29 = vmul.f32 %v989_v15, %v88_v21 }
  0x38   :  { %297 = vst [vmem:[#allocation1 + $0x20] ss:$4 sm:$0xff] %v149_v26 }
  0x39   :  { %298 = vst [vmem:[#allocation1 + $0x21] ss:$4 sm:$0xff] %v150_v27 }
  0x3a   :  { %299 = vst [vmem:[#allocation1 + $0x22] ss:$4 sm:$0xff] %v151_v30  ;;  %v91_v30 = vld [vmem:[#allocation4 + $0xd8] sm:$0xf] }
  0x3b   :  { %300 = vst [vmem:[#allocation1 + $0x23] ss:$4 sm:$0xff] %v152_v31  ;;  %v92_v31 = vld [vmem:[#allocation4 + $0xdc] sm:$0xf] }
  0x3d   :  { %401 = vadd.xlane.f32.xlu2 %v400_v33  ;;  %v174_v33 = vmul.f32 %v985_v13, %v90_v25 }
  0x3e   :  { %v301_v42 = vld.sshfl [vmem:[#allocation1] sm:$0xff pattern:$0x73625140]  ;;  %v302_v43 = vld.sshfl [vmem:[#allocation1 + $0x8] sm:$0xff pattern:$0x73625140] }
  0x3f   :  { %v403_v44 = vadd.f32 %v302_v43, %v301_v42  ;;  %305 = vst [vmem:[#allocation1] ss:$4 sm:$0xff] %v153_v36  ;;  %v175_v36 = vmul.f32 %v987_v14, %v91_v30  ;;  %v96_v43 = vld [vmem:[#allocation4 + $0xec] sm:$0xf] }
  0x40   :  { %306 = vst [vmem:[#allocation1 + $0x1] ss:$4 sm:$0xff] %v154_v38  ;;  %v176_v38 = vmul.f32 %v989_v15, %v92_v31 }
  0x41   :  { %404 = vadd.xlane.f32.xlu0 %v403_v44  ;;  %307 = vst [vmem:[#allocation1 + $0x2] ss:$4 sm:$0xff] %v155_v39  ;;  %v93_v39 = vld [vmem:[#allocation4 + $0xe0] sm:$0xf]  ;;  %v178_v44 = vmul.f32 %v985_v13, %v94_v40 }
  0x42   :  { %v303_v50 = vld.sshfl [vmem:[#allocation1 + $0x20] sm:$0xff pattern:$0x73625140]  ;;  %v304_v51 = vld.sshfl [vmem:[#allocation1 + $0x28] sm:$0xff pattern:$0x73625140]  ;;  %v177_v42 = vmul.f32 %v983_v9, %v93_v39 }
  0x43   :  { %v406_v53 = vadd.f32 %v304_v51, %v303_v50  ;;  %308 = vst [vmem:[#allocation1 + $0x3] ss:$4 sm:$0xff] %v156_v45  ;;  %v179_v45 = vmul.f32 %v987_v14, %v95_v41  ;;  %v180_v51 = vmul.f32 %v989_v15, %v96_v43 }
  0x44   :  { %309 = vst [vmem:[#allocation1 + $0x20] ss:$4 sm:$0xff] %v157_v48 }
  0x45   :  { %407 = vadd.xlane.f32.xlu1 %v406_v53  ;;  %310 = vst [vmem:[#allocation1 + $0x21] ss:$4 sm:$0xff] %v158_v49  ;;  %v100_v53 = vld [vmem:[#allocation4 + $0xfc] sm:$0xf] }
  0x46   :  { %311 = vst [vmem:[#allocation1 + $0x22] ss:$4 sm:$0xff] %v159_v52  ;;  %v99_v52 = vld [vmem:[#allocation4 + $0xf8] sm:$0xf] }
  0x47   :  { %312 = vst [vmem:[#allocation1 + $0x23] ss:$4 sm:$0xff] %v160_v54  ;;  %v181_v54 = vmul.f32 %v983_v9, %v97_v46 }
  0x4a   :  { %v313_v0 = vld.sshfl [vmem:[#allocation1] sm:$0xff pattern:$0x73625140]  ;;  %v314_v1 = vld.sshfl [vmem:[#allocation1 + $0x8] sm:$0xff pattern:$0x73625140] }
  0x4b   :  { %v409_v2 = vadd.f32 %v314_v1, %v313_v0  ;;  %317 = vst [vmem:[#allocation1] ss:$4 sm:$0xff] %v161_v58  ;;  %v183_v58 = vmul.f32 %v987_v14, %v99_v52  ;;  %v954_v1 = vmov 0  }
  0x4c   :  { %318 = vst [vmem:[#allocation1 + $0x1] ss:$4 sm:$0xff] %v162_v60  ;;  %v184_v60 = vmul.f32 %v989_v15, %v100_v53  ;;  %892 = vset.pattern.permute.xlu1 %v954_v1  ;;  %893 = vset.pattern.permute.xlu2 %v954_v1 }
  0x4d   :  { %410 = vadd.xlane.f32.xlu2 %v409_v2  ;;  %319 = vst [vmem:[#allocation1 + $0x2] ss:$4 sm:$0xff] %v163_v61  ;;  %894 = vset.pattern.permute.xlu0 %v954_v1 }
  0x4e   :  { %v315_v8 = vld.sshfl [vmem:[#allocation1 + $0x20] sm:$0xff pattern:$0x73625140]  ;;  %v316_v10 = vld.sshfl [vmem:[#allocation1 + $0x28] sm:$0xff pattern:$0x73625140] }
  0x4f   :  { %v412_v12 = vadd.f32 %v316_v10, %v315_v8  ;;  %320 = vst [vmem:[#allocation1 + $0x3] ss:$4 sm:$0xff] %v164_v3 }
  0x50   :  { %321 = vst [vmem:[#allocation1 + $0x20] ss:$4 sm:$0xff] %v165_v6 }
  0x51   :  { %413 = vadd.xlane.f32.xlu0 %v412_v12  ;;  %322 = vst [vmem:[#allocation1 + $0x21] ss:$4 sm:$0xff] %v166_v7 }
  0x52   :  { %323 = vst [vmem:[#allocation1 + $0x22] ss:$4 sm:$0xff] %v167_v11 }
  0x53   :  { %324 = vst [vmem:[#allocation1 + $0x23] ss:$4 sm:$0xff] %v168_v16 }
  0x56   :  { %v325_v26 = vld.sshfl [vmem:[#allocation1] sm:$0xff pattern:$0x73625140]  ;;  %v326_v27 = vld.sshfl [vmem:[#allocation1 + $0x8] sm:$0xff pattern:$0x73625140] }
  0x57   :  { %v415_v28 = vadd.f32 %v326_v27, %v325_v26  ;;  %329 = vst [vmem:[#allocation1] ss:$4 sm:$0xff] %v169_v20 }
  0x58   :  { %330 = vst [vmem:[#allocation1 + $0x1] ss:$4 sm:$0xff] %v170_v22 }
  0x59   :  { %416 = vadd.xlane.f32.xlu1 %v415_v28  ;;  %331 = vst [vmem:[#allocation1 + $0x2] ss:$4 sm:$0xff] %v171_v23 }
  0x5a   :  { %v327_v34 = vld.sshfl [vmem:[#allocation1 + $0x20] sm:$0xff pattern:$0x73625140]  ;;  %v328_v35 = vld.sshfl [vmem:[#allocation1 + $0x28] sm:$0xff pattern:$0x73625140] }
  0x5b   :  { %v418_v37 = vadd.f32 %v328_v35, %v327_v34  ;;  %332 = vst [vmem:[#allocation1 + $0x3] ss:$4 sm:$0xff] %v172_v29 }
  0x5c   :  { %333 = vst [vmem:[#allocation1 + $0x20] ss:$4 sm:$0xff] %v173_v32 }
  0x5d   :  { %419 = vadd.xlane.f32.xlu2 %v418_v37  ;;  %334 = vst [vmem:[#allocation1 + $0x21] ss:$4 sm:$0xff] %v174_v33 }
  0x5e   :  { %335 = vst [vmem:[#allocation1 + $0x22] ss:$4 sm:$0xff] %v175_v36 }
  0x5f   :  { %336 = vst [vmem:[#allocation1 + $0x23] ss:$4 sm:$0xff] %v176_v38 }
  0x62   :  { %v337_v48 = vld.sshfl [vmem:[#allocation1] sm:$0xff pattern:$0x73625140]  ;;  %v338_v49 = vld.sshfl [vmem:[#allocation1 + $0x8] sm:$0xff pattern:$0x73625140] }
  0x63   :  { %v421_v50 = vadd.f32 %v338_v49, %v337_v48  ;;  %341 = vst [vmem:[#allocation1] ss:$4 sm:$0xff] %v177_v42 }
  0x64   :  { %342 = vst [vmem:[#allocation1 + $0x1] ss:$4 sm:$0xff] %v178_v44 }
  0x65   :  { %422 = vadd.xlane.f32.xlu0 %v421_v50  ;;  %343 = vst [vmem:[#allocation1 + $0x2] ss:$4 sm:$0xff] %v179_v45 }
  0x66   :  { %v339_v56 = vld.sshfl [vmem:[#allocation1 + $0x20] sm:$0xff pattern:$0x73625140]  ;;  %v340_v57 = vld.sshfl [vmem:[#allocation1 + $0x28] sm:$0xff pattern:$0x73625140] }
  0x67   :  { %v424_v59 = vadd.f32 %v340_v57, %v339_v56  ;;  %344 = vst [vmem:[#allocation1 + $0x3] ss:$4 sm:$0xff] %v180_v51 }
  0x68   :  { %345 = vst [vmem:[#allocation1 + $0x20] ss:$4 sm:$0xff] %v181_v54 }
  0x69   :  { %425 = vadd.xlane.f32.xlu1 %v424_v59  ;;  %346 = vst [vmem:[#allocation1 + $0x21] ss:$4 sm:$0xff] %v182_v55 }
  0x6a   :  { %347 = vst [vmem:[#allocation1 + $0x22] ss:$4 sm:$0xff] %v183_v58 }
  0x6b   :  { %348 = vst [vmem:[#allocation1 + $0x23] ss:$4 sm:$0xff] %v184_v60 }
  0x6e   :  { %v349_v61 = vld.sshfl [vmem:[#allocation1] sm:$0xff pattern:$0x73625140]  ;;  %v350_v62 = vld.sshfl [vmem:[#allocation1 + $0x8] sm:$0xff pattern:$0x73625140] }
  0x6f   :  { %v427_v9 = vadd.f32 %v350_v62, %v349_v61 }
  0x71   :  { %428 = vadd.xlane.f32.xlu2 %v427_v9 }
  0x72   :  { %v351_v63 = vld.sshfl [vmem:[#allocation1 + $0x20] sm:$0xff pattern:$0x73625140]  ;;  %v352_v0 = vld.sshfl [vmem:[#allocation1 + $0x28] sm:$0xff pattern:$0x73625140] }
  0x73   :  { %v430_v13 = vadd.f32 %v352_v0, %v351_v63 }
  0x75   :  { %431 = vadd.xlane.f32.xlu0 %v430_v13 }
  0x90   :  { %v387_v14 = vpop.xlane.xlu0 %386 }
  0x91   :  { %v449_v2 = vperm.slane %v387_v14, 0  ;;  %v450_v15 = vperm.slane %v387_v14, 1  ;;  %v451_v3 = vperm.slane %v387_v14, 2  ;;  %v452_v4 = vperm.slane %v387_v14, 3 }
  0x92   :  { %v453_v5 = vperm.slane %v387_v14, 4  ;;  %v454_v6 = vperm.slane %v387_v14, 5  ;;  %v455_v7 = vperm.slane %v387_v14, 6  ;;  %v456_v8 = vperm.slane %v387_v14, 7 }
  0x93   :  { %577 = vst [vmem:[#allocation1] ss:$9 sm:$0xff] %v449_v2 }
  0x94   :  { %579 = vst [vmem:[#allocation1 + $0x1] ss:$9 sm:$0xff] %v450_v15 }
  0x95   :  { %581 = vst [vmem:[#allocation1 + $0x2] ss:$9 sm:$0xff] %v451_v3 }
  0x96   :  { %583 = vst [vmem:[#allocation1 + $0x3] ss:$9 sm:$0xff] %v452_v4 }
  0x97   :  { %585 = vst [vmem:[#allocation1 + $0x4] ss:$9 sm:$0xff] %v453_v5 }
  0x98   :  { %587 = vst [vmem:[#allocation1 + $0x5] ss:$9 sm:$0xff] %v454_v6  ;;  %v390_v10 = vpop.xlane.xlu0 %389 }
  0x99   :  { %589 = vst [vmem:[#allocation1 + $0x6] ss:$9 sm:$0xff] %v455_v7  ;;  %v457_v11 = vperm.slane %v390_v10, 0  ;;  %v458_v12 = vperm.slane %v390_v10, 1  ;;  %v459_v16 = vperm.slane %v390_v10, 2  ;;  %v460_v18 = vperm.slane %v390_v10, 3 }
  0x9a   :  { %591 = vst [vmem:[#allocation1 + $0x7] ss:$9 sm:$0xff] %v456_v8  ;;  %v461_v19 = vperm.slane %v390_v10, 4  ;;  %v462_v20 = vperm.slane %v390_v10, 5  ;;  %v463_v21 = vperm.slane %v390_v10, 6  ;;  %v464_v22 = vperm.slane %v390_v10, 7 }
  0x9c   :  { %v393_v23 = vpop.xlane.xlu1 %392 }
  0x9d   :  { %v465_v24 = vperm.slane %v393_v23, 0  ;;  %v466_v25 = vperm.slane %v393_v23, 1  ;;  %v467_v26 = vperm.slane %v393_v23, 2  ;;  %v468_v28 = vperm.slane %v393_v23, 3 }
  0x9e   :  { %v469_v29 = vperm.slane %v393_v23, 4  ;;  %v470_v30 = vperm.slane %v393_v23, 5  ;;  %v471_v31 = vperm.slane %v393_v23, 6  ;;  %v472_v32 = vperm.slane %v393_v23, 7 }
  0xa1   :  { %v592_v17 = vld [vmem:[#allocation1] sm:$0xff] }
  0xa2   :  { %593 = vst [vmem:[#allocation1] ss:$9 sm:$0xff] %v457_v11  ;;  %729 = vperm.xlu1 %892, %v592_v17  }
  0xa3   :  { %594 = vst [vmem:[#allocation1 + $0x1] ss:$9 sm:$0xff] %v458_v12 }
  0xa4   :  { %595 = vst [vmem:[#allocation1 + $0x2] ss:$9 sm:$0xff] %v459_v16  ;;  %v396_v33 = vpop.xlane.xlu1 %395 }
  0xa5   :  { %596 = vst [vmem:[#allocation1 + $0x3] ss:$9 sm:$0xff] %v460_v18  ;;  %v473_v34 = vperm.slane %v396_v33, 0  ;;  %v474_v35 = vperm.slane %v396_v33, 1  ;;  %v475_v36 = vperm.slane %v396_v33, 2  ;;  %v476_v38 = vperm.slane %v396_v33, 3 }
  0xa6   :  { %597 = vst [vmem:[#allocation1 + $0x4] ss:$9 sm:$0xff] %v461_v19  ;;  %v477_v39 = vperm.slane %v396_v33, 4  ;;  %v478_v40 = vperm.slane %v396_v33, 5  ;;  %v479_v41 = vperm.slane %v396_v33, 6  ;;  %v480_v42 = vperm.slane %v396_v33, 7 }
  0xa7   :  { %598 = vst [vmem:[#allocation1 + $0x5] ss:$9 sm:$0xff] %v462_v20 }
  0xa8   :  { %599 = vst [vmem:[#allocation1 + $0x6] ss:$9 sm:$0xff] %v463_v21  ;;  %v399_v43 = vpop.xlane.xlu2 %398 }
  0xa9   :  { %600 = vst [vmem:[#allocation1 + $0x7] ss:$9 sm:$0xff] %v464_v22  ;;  %v481_v44 = vperm.slane %v399_v43, 0  ;;  %v482_v45 = vperm.slane %v399_v43, 1  ;;  %v483_v46 = vperm.slane %v399_v43, 2  ;;  %v484_v48 = vperm.slane %v399_v43, 3 }
  0xaa   :  { %v485_v49 = vperm.slane %v399_v43, 4  ;;  %v486_v50 = vperm.slane %v399_v43, 5  ;;  %v487_v51 = vperm.slane %v399_v43, 6  ;;  %v488_v52 = vperm.slane %v399_v43, 7 }
  0xb0   :  { %v601_v27 = vld [vmem:[#allocation1] sm:$0xff]  ;;  %v402_v53 = vpop.xlane.xlu2 %401 }
  0xb1   :  { %602 = vst [vmem:[#allocation1] ss:$9 sm:$0xff] %v465_v24  ;;  %732 = vperm.xlu2 %893, %v601_v27   ;;  %v489_v54 = vperm.slane %v402_v53, 0  ;;  %v490_v55 = vperm.slane %v402_v53, 1  ;;  %v491_v56 = vperm.slane %v402_v53, 2  ;;  %v492_v58 = vperm.slane %v402_v53, 3 }
  0xb2   :  { %603 = vst [vmem:[#allocation1 + $0x1] ss:$9 sm:$0xff] %v466_v25  ;;  %v493_v59 = vperm.slane %v402_v53, 4  ;;  %v494_v60 = vperm.slane %v402_v53, 5  ;;  %v495_v61 = vperm.slane %v402_v53, 6  ;;  %v496_v62 = vperm.slane %v402_v53, 7 }
  0xb3   :  { %604 = vst [vmem:[#allocation1 + $0x2] ss:$9 sm:$0xff] %v467_v26 }
  0xb4   :  { %605 = vst [vmem:[#allocation1 + $0x3] ss:$9 sm:$0xff] %v468_v28  ;;  %v405_v9 = vpop.xlane.xlu0 %404 }
  0xb5   :  { %606 = vst [vmem:[#allocation1 + $0x4] ss:$9 sm:$0xff] %v469_v29  ;;  %v497_v63 = vperm.slane %v405_v9, 0  ;;  %v498_v0 = vperm.slane %v405_v9, 1  ;;  %v499_v13 = vperm.slane %v405_v9, 2  ;;  %v500_v14 = vperm.slane %v405_v9, 3 }
  0xb6   :  { %607 = vst [vmem:[#allocation1 + $0x5] ss:$9 sm:$0xff] %v470_v30  ;;  %v501_v2 = vperm.slane %v405_v9, 4  ;;  %v502_v15 = vperm.slane %v405_v9, 5  ;;  %v503_v3 = vperm.slane %v405_v9, 6  ;;  %v504_v4 = vperm.slane %v405_v9, 7 }
  0xb7   :  { %608 = vst [vmem:[#allocation1 + $0x6] ss:$9 sm:$0xff] %v471_v31 }
  0xb8   :  { %609 = vst [vmem:[#allocation1 + $0x7] ss:$9 sm:$0xff] %v472_v32  ;;  %v408_v5 = vpop.xlane.xlu1 %407 }
  0xb9   :  { %v505_v6 = vperm.slane %v408_v5, 0  ;;  %v506_v7 = vperm.slane %v408_v5, 1  ;;  %v507_v8 = vperm.slane %v408_v5, 2  ;;  %v508_v11 = vperm.slane %v408_v5, 3 }
  0xba   :  { %v509_v12 = vperm.slane %v408_v5, 4  ;;  %v510_v16 = vperm.slane %v408_v5, 5  ;;  %v511_v17 = vperm.slane %v408_v5, 6  ;;  %v512_v18 = vperm.slane %v408_v5, 7 }
  0xbf   :  { %v610_v37 = vld [vmem:[#allocation1] sm:$0xff] }
  0xc0   :  { %611 = vst [vmem:[#allocation1] ss:$9 sm:$0xff] %v473_v34  ;;  %735 = vperm.xlu0 %894, %v610_v37   ;;  %v411_v19 = vpop.xlane.xlu2 %410 }
  0xc1   :  { %612 = vst [vmem:[#allocation1 + $0x1] ss:$9 sm:$0xff] %v474_v35  ;;  %v513_v20 = vperm.slane %v411_v19, 0  ;;  %v514_v21 = vperm.slane %v411_v19, 1  ;;  %v515_v22 = vperm.slane %v411_v19, 2  ;;  %v516_v24 = vperm.slane %v411_v19, 3 }
  0xc2   :  { %613 = vst [vmem:[#allocation1 + $0x2] ss:$9 sm:$0xff] %v475_v36  ;;  %v517_v25 = vperm.slane %v411_v19, 4  ;;  %v518_v26 = vperm.slane %v411_v19, 5  ;;  %v519_v27 = vperm.slane %v411_v19, 6  ;;  %v520_v28 = vperm.slane %v411_v19, 7 }
  0xc3   :  { %614 = vst [vmem:[#allocation1 + $0x3] ss:$9 sm:$0xff] %v476_v38 }
  0xc4   :  { %615 = vst [vmem:[#allocation1 + $0x4] ss:$9 sm:$0xff] %v477_v39  ;;  %v414_v29 = vpop.xlane.xlu0 %413 }
  0xc5   :  { %616 = vst [vmem:[#allocation1 + $0x5] ss:$9 sm:$0xff] %v478_v40  ;;  %v521_v30 = vperm.slane %v414_v29, 0  ;;  %v522_v31 = vperm.slane %v414_v29, 1  ;;  %v523_v32 = vperm.slane %v414_v29, 2  ;;  %v524_v34 = vperm.slane %v414_v29, 3 }
  0xc6   :  { %617 = vst [vmem:[#allocation1 + $0x6] ss:$9 sm:$0xff] %v479_v41  ;;  %v525_v35 = vperm.slane %v414_v29, 4  ;;  %v526_v36 = vperm.slane %v414_v29, 5  ;;  %v527_v37 = vperm.slane %v414_v29, 6  ;;  %v528_v38 = vperm.slane %v414_v29, 7 }
  0xc7   :  { %618 = vst [vmem:[#allocation1 + $0x7] ss:$9 sm:$0xff] %v480_v42 }
  0xcc   :  { %v417_v39 = vpop.xlane.xlu1 %416 }
  0xcd   :  { %v529_v40 = vperm.slane %v417_v39, 0  ;;  %v530_v41 = vperm.slane %v417_v39, 1  ;;  %v531_v42 = vperm.slane %v417_v39, 2  ;;  %v532_v43 = vperm.slane %v417_v39, 3 }
  0xce   :  { %v619_v47 = vld [vmem:[#allocation1] sm:$0xff] }
  0xcf   :  { %620 = vst [vmem:[#allocation1] ss:$9 sm:$0xff] %v481_v44  ;;  %738 = vperm.xlu2 %893, %v619_v47   ;;  %v535_v47 = vperm.slane %v417_v39, 6 }
  0xd0   :  { %621 = vst [vmem:[#allocation1 + $0x1] ss:$9 sm:$0xff] %v482_v45  ;;  %v533_v45 = vperm.slane %v417_v39, 4 }
  0xd1   :  { %622 = vst [vmem:[#allocation1 + $0x2] ss:$9 sm:$0xff] %v483_v46  ;;  %v534_v46 = vperm.slane %v417_v39, 5 }
  0xd2   :  { %623 = vst [vmem:[#allocation1 + $0x3] ss:$9 sm:$0xff] %v484_v48  ;;  %v536_v48 = vperm.slane %v417_v39, 7 }
  0xd3   :  { %624 = vst [vmem:[#allocation1 + $0x4] ss:$9 sm:$0xff] %v485_v49  ;;  %v420_v49 = vpop.xlane.xlu2 %419 }
  0xd4   :  { %625 = vst [vmem:[#allocation1 + $0x5] ss:$9 sm:$0xff] %v486_v50  ;;  %v537_v50 = vperm.slane %v420_v49, 0  ;;  %v540_v53 = vperm.slane %v420_v49, 3 }
  0xd5   :  { %626 = vst [vmem:[#allocation1 + $0x6] ss:$9 sm:$0xff] %v487_v51  ;;  %v538_v51 = vperm.slane %v420_v49, 1 }
  0xd6   :  { %627 = vst [vmem:[#allocation1 + $0x7] ss:$9 sm:$0xff] %v488_v52  ;;  %v539_v52 = vperm.slane %v420_v49, 2 }
  0xdd   :  { %v628_v57 = vld [vmem:[#allocation1] sm:$0xff] }
  0xde   :  { %629 = vst [vmem:[#allocation1] ss:$9 sm:$0xff] %v489_v54  ;;  %741 = vperm.xlu1 %892, %v628_v57   ;;  %v543_v57 = vperm.slane %v420_v49, 6 }
  0xdf   :  { %630 = vst [vmem:[#allocation1 + $0x1] ss:$9 sm:$0xff] %v490_v55  ;;  %v541_v55 = vperm.slane %v420_v49, 4 }
  0xe0   :  { %631 = vst [vmem:[#allocation1 + $0x2] ss:$9 sm:$0xff] %v491_v56  ;;  %v542_v56 = vperm.slane %v420_v49, 5 }
  0xe1   :  { %632 = vst [vmem:[#allocation1 + $0x3] ss:$9 sm:$0xff] %v492_v58  ;;  %v544_v58 = vperm.slane %v420_v49, 7 }
  0xe2   :  { %633 = vst [vmem:[#allocation1 + $0x4] ss:$9 sm:$0xff] %v493_v59  ;;  %v423_v59 = vpop.xlane.xlu0 %422 }
  0xe3   :  { %634 = vst [vmem:[#allocation1 + $0x5] ss:$9 sm:$0xff] %v494_v60  ;;  %v545_v60 = vperm.slane %v423_v59, 0  ;;  %v548_v9 = vperm.slane %v423_v59, 3 }
  0xe4   :  { %635 = vst [vmem:[#allocation1 + $0x6] ss:$9 sm:$0xff] %v495_v61  ;;  %v546_v61 = vperm.slane %v423_v59, 1 }
  0xe5   :  { %636 = vst [vmem:[#allocation1 + $0x7] ss:$9 sm:$0xff] %v496_v62  ;;  %v547_v62 = vperm.slane %v423_v59, 2 }
  0xec   :  { %v637_v1 = vld [vmem:[#allocation1] sm:$0xff] }
  0xed   :  { %638 = vst [vmem:[#allocation1] ss:$9 sm:$0xff] %v497_v63  ;;  %744 = vperm.xlu2 %893, %v637_v1   ;;  %v551_v1 = vperm.slane %v423_v59, 6 }
  0xee   :  { %639 = vst [vmem:[#allocation1 + $0x1] ss:$9 sm:$0xff] %v498_v0  ;;  %v549_v0 = vperm.slane %v423_v59, 4 }
  0xef   :  { %640 = vst [vmem:[#allocation1 + $0x2] ss:$9 sm:$0xff] %v499_v13  ;;  %v550_v13 = vperm.slane %v423_v59, 5 }
  0xf0   :  { %641 = vst [vmem:[#allocation1 + $0x3] ss:$9 sm:$0xff] %v500_v14  ;;  %v552_v14 = vperm.slane %v423_v59, 7 }
  0xf1   :  { %642 = vst [vmem:[#allocation1 + $0x4] ss:$9 sm:$0xff] %v501_v2  ;;  %v426_v2 = vpop.xlane.xlu1 %425 }
  0xf2   :  { %643 = vst [vmem:[#allocation1 + $0x5] ss:$9 sm:$0xff] %v502_v15  ;;  %v553_v15 = vperm.slane %v426_v2, 0  ;;  %v556_v5 = vperm.slane %v426_v2, 3 }
  0xf3   :  { %644 = vst [vmem:[#allocation1 + $0x6] ss:$9 sm:$0xff] %v503_v3  ;;  %v554_v3 = vperm.slane %v426_v2, 1 }
  0xf4   :  { %645 = vst [vmem:[#allocation1 + $0x7] ss:$9 sm:$0xff] %v504_v4  ;;  %v555_v4 = vperm.slane %v426_v2, 2 }
  0xfb   :  { %v646_v10 = vld [vmem:[#allocation1] sm:$0xff] }
  0xfc   :  { %647 = vst [vmem:[#allocation1] ss:$9 sm:$0xff] %v505_v6  ;;  %747 = vperm.xlu1 %892, %v646_v10   ;;  %v559_v10 = vperm.slane %v426_v2, 6 }
  0xfd   :  { %648 = vst [vmem:[#allocation1 + $0x1] ss:$9 sm:$0xff] %v506_v7  ;;  %v557_v7 = vperm.slane %v426_v2, 4 }
  0xfe   :  { %649 = vst [vmem:[#allocation1 + $0x2] ss:$9 sm:$0xff] %v507_v8  ;;  %v558_v8 = vperm.slane %v426_v2, 5 }
  0xff   :  { %650 = vst [vmem:[#allocation1 + $0x3] ss:$9 sm:$0xff] %v508_v11  ;;  %v560_v11 = vperm.slane %v426_v2, 7 }
 0x100   :  { %651 = vst [vmem:[#allocation1 + $0x4] ss:$9 sm:$0xff] %v509_v12  ;;  %v429_v12 = vpop.xlane.xlu2 %428 }
 0x101   :  { %652 = vst [vmem:[#allocation1 + $0x5] ss:$9 sm:$0xff] %v510_v16  ;;  %v561_v16 = vperm.slane %v429_v12, 0  ;;  %v564_v19 = vperm.slane %v429_v12, 3 }
 0x102   :  { %653 = vst [vmem:[#allocation1 + $0x6] ss:$9 sm:$0xff] %v511_v17  ;;  %v562_v17 = vperm.slane %v429_v12, 1 }
 0x103   :  { %654 = vst [vmem:[#allocation1 + $0x7] ss:$9 sm:$0xff] %v512_v18  ;;  %v563_v18 = vperm.slane %v429_v12, 2 }
 0x10a   :  { %v655_v23 = vld [vmem:[#allocation1] sm:$0xff] }
 0x10b   :  { %656 = vst [vmem:[#allocation1] ss:$9 sm:$0xff] %v513_v20  ;;  %750 = vperm.xlu2 %893, %v655_v23   ;;  %v567_v23 = vperm.slane %v429_v12, 6 }
 0x10c   :  { %657 = vst [vmem:[#allocation1 + $0x1] ss:$9 sm:$0xff] %v514_v21  ;;  %v565_v21 = vperm.slane %v429_v12, 4 }
 0x10d   :  { %658 = vst [vmem:[#allocation1 + $0x2] ss:$9 sm:$0xff] %v515_v22  ;;  %v566_v22 = vperm.slane %v429_v12, 5 }
 0x10e   :  { %659 = vst [vmem:[#allocation1 + $0x3] ss:$9 sm:$0xff] %v516_v24  ;;  %v568_v24 = vperm.slane %v429_v12, 7 }
 0x10f   :  { %660 = vst [vmem:[#allocation1 + $0x4] ss:$9 sm:$0xff] %v517_v25  ;;  %v432_v25 = vpop.xlane.xlu0 %431 }
 0x110   :  { %661 = vst [vmem:[#allocation1 + $0x5] ss:$9 sm:$0xff] %v518_v26  ;;  %v569_v26 = vperm.slane %v432_v25, 0  ;;  %v572_v29 = vperm.slane %v432_v25, 3 }
 0x111   :  { %662 = vst [vmem:[#allocation1 + $0x6] ss:$9 sm:$0xff] %v519_v27  ;;  %v570_v27 = vperm.slane %v432_v25, 1 }
 0x112   :  { %663 = vst [vmem:[#allocation1 + $0x7] ss:$9 sm:$0xff] %v520_v28  ;;  %v571_v28 = vperm.slane %v432_v25, 2 }
 0x119   :  { %v664_v33 = vld [vmem:[#allocation1] sm:$0xff] }
 0x11a   :  { %665 = vst [vmem:[#allocation1] ss:$9 sm:$0xff] %v521_v30  ;;  %753 = vperm.xlu1 %892, %v664_v33   ;;  %v575_v33 = vperm.slane %v432_v25, 6 }
 0x11b   :  { %666 = vst [vmem:[#allocation1 + $0x1] ss:$9 sm:$0xff] %v522_v31  ;;  %v573_v31 = vperm.slane %v432_v25, 4 }
 0x11c   :  { %667 = vst [vmem:[#allocation1 + $0x2] ss:$9 sm:$0xff] %v523_v32  ;;  %v574_v32 = vperm.slane %v432_v25, 5 }
 0x11d   :  { %668 = vst [vmem:[#allocation1 + $0x3] ss:$9 sm:$0xff] %v524_v34  ;;  %v576_v34 = vperm.slane %v432_v25, 7 }
 0x11e   :  { %669 = vst [vmem:[#allocation1 + $0x4] ss:$9 sm:$0xff] %v525_v35 }
 0x11f   :  { %670 = vst [vmem:[#allocation1 + $0x5] ss:$9 sm:$0xff] %v526_v36  ;;  %v730_v36 = vpop.permute.xlu1 %729 }
 0x120   :  { %671 = vst [vmem:[#allocation1 + $0x6] ss:$9 sm:$0xff] %v527_v37  ;;  %v733_v37 = vpop.permute.xlu2 %732 }
 0x121   :  { %672 = vst [vmem:[#allocation1 + $0x7] ss:$9 sm:$0xff] %v528_v38  ;;  %v955_v38 = vmov 0.0  }
 0x122   :  { %36 = vst [vmem:[#allocation2] sm:$0x1] %v955_v38 }
 0x128   :  { %v673_v44 = vld [vmem:[#allocation1] sm:$0xff] }
 0x129   :  { %756 = vperm.xlu0 %894, %v673_v44   ;;  %674 = vst [vmem:[#allocation1] ss:$9 sm:$0xff] %v529_v40  ;;  %v739_v40 = vpop.permute.xlu2 %738 }
 0x12a   :  { %675 = vst [vmem:[#allocation1 + $0x1] ss:$9 sm:$0xff] %v530_v41  ;;  %v776_v41 = vlaneseq }
 0x12b   :  { %676 = vst [vmem:[#allocation1 + $0x2] ss:$9 sm:$0xff] %v531_v42 }
 0x12c   :  { %677 = vst [vmem:[#allocation1 + $0x3] ss:$9 sm:$0xff] %v532_v43  ;;  %v1055_v42 = vand.u32 127, %v776_v41 }
 0x12d   :  { %678 = vst [vmem:[#allocation1 + $0x4] ss:$9 sm:$0xff] %v533_v45 }
 0x12e   :  { %679 = vst [vmem:[#allocation1 + $0x5] ss:$9 sm:$0xff] %v534_v46  ;;  %v783_v44 = vadd.s32 4294967280, %v1055_v42  ;;  %v779_v46 = vadd.s32 4294967288, %v1055_v42 }
 0x12f   :  { %680 = vst [vmem:[#allocation1 + $0x6] ss:$9 sm:$0xff] %v535_v47 }
 0x130   :  { %681 = vst [vmem:[#allocation1 + $0x7] ss:$9 sm:$0xff] %v536_v48  ;;  %v778_v48 = vperm.slane %v730_v36, %v1055_v42 }
 0x132   :  { %v736_v47 = vpop.permute.xlu0 %735 }
 0x133   :  { %v784_v49 = vperm.slane %v736_v47, %v783_v44 }
 0x137   :  { %v682_v54 = vld [vmem:[#allocation1] sm:$0xff] }
 0x138   :  { %759 = vperm.xlu2 %893, %v682_v54   ;;  %683 = vst [vmem:[#allocation1] ss:$9 sm:$0xff] %v537_v50  ;;  %v791_v50 = vadd.s32 4294967264, %v1055_v42 }
 0x139   :  { %684 = vst [vmem:[#allocation1 + $0x1] ss:$9 sm:$0xff] %v538_v51  ;;  %v780_v51 = vperm.slane %v733_v37, %v779_v46 }
 0x13a   :  { %685 = vst [vmem:[#allocation1 + $0x2] ss:$9 sm:$0xff] %v539_v52  ;;  %v787_v52 = vadd.s32 4294967272, %v1055_v42 }
 0x13b   :  { %686 = vst [vmem:[#allocation1 + $0x3] ss:$9 sm:$0xff] %v540_v53  ;;  %v782_v53 = vsel %vm781_vm4, %v780_v51, %v778_v48 }
 0x13c   :  { %687 = vst [vmem:[#allocation1 + $0x4] ss:$9 sm:$0xff] %v541_v55  ;;  %v786_v55 = vsel %vm785_vm5, %v784_v49, %v782_v53  ;;  %v788_v59 = vperm.slane %v739_v40, %v787_v52 }
 0x13d   :  { %688 = vst [vmem:[#allocation1 + $0x5] ss:$9 sm:$0xff] %v542_v56 }
 0x13e   :  { %689 = vst [vmem:[#allocation1 + $0x6] ss:$9 sm:$0xff] %v543_v57 }
 0x13f   :  { %690 = vst [vmem:[#allocation1 + $0x7] ss:$9 sm:$0xff] %v544_v58  ;;  %v799_v58 = vadd.s32 4294967248, %v1055_v42 }
 0x146   :  { %v691_v63 = vld [vmem:[#allocation1] sm:$0xff] }
 0x147   :  { %762 = vperm.xlu1 %892, %v691_v63   ;;  %692 = vst [vmem:[#allocation1] ss:$9 sm:$0xff] %v545_v60  ;;  %v745_v45 = vpop.permute.xlu2 %744  ;;  %v795_v60 = vadd.s32 4294967256, %v1055_v42 }
 0x148   :  { %693 = vst [vmem:[#allocation1 + $0x1] ss:$9 sm:$0xff] %v546_v61  ;;  %v790_v61 = vsel %vm789_vm6, %v788_v59, %v786_v55 }
 0x149   :  { %694 = vst [vmem:[#allocation1 + $0x2] ss:$9 sm:$0xff] %v547_v62 }
 0x14a   :  { %695 = vst [vmem:[#allocation1 + $0x3] ss:$9 sm:$0xff] %v548_v9 }
 0x14b   :  { %696 = vst [vmem:[#allocation1 + $0x4] ss:$9 sm:$0xff] %v549_v0  ;;  %v807_v0 = vadd.s32 4294967232, %v1055_v42 }
 0x14c   :  { %697 = vst [vmem:[#allocation1 + $0x5] ss:$9 sm:$0xff] %v550_v13  ;;  %v796_v13 = vperm.slane %v745_v45, %v795_v60 }
 0x14d   :  { %698 = vst [vmem:[#allocation1 + $0x6] ss:$9 sm:$0xff] %v551_v1  ;;  %v803_v1 = vadd.s32 4294967240, %v1055_v42 }
 0x14e   :  { %699 = vst [vmem:[#allocation1 + $0x7] ss:$9 sm:$0xff] %v552_v14  ;;  %v811_v14 = vadd.s32 4294967224, %v1055_v42 }
 0x150   :  { %v742_v39 = vpop.permute.xlu1 %741 }
 0x151   :  { %v792_v56 = vperm.slane %v742_v39, %v791_v50  ;;  %v847_v39 = vstv %s1081_s2  ;;  %s876_s2 = sshll.u32 %s1082_s3, 4  ;;  %s877_s2 = int_to_ptr.hbm [resolvable:$true] %s876_s2 }
 0x153   :  { %v794_v9 = vsel %vm793_vm7, %v792_v56, %v790_v61 }
 0x154   :  { %v798_v2 = vsel %vm797_vm8, %v796_v13, %v794_v9 }
 0x155   :  { %v700_v6 = vld [vmem:[#allocation1] sm:$0xff] }
 0x156   :  { %765 = vperm.xlu0 %894, %v700_v6   ;;  %701 = vst [vmem:[#allocation1] ss:$9 sm:$0xff] %v553_v15 }
 0x157   :  { %702 = vst [vmem:[#allocation1 + $0x1] ss:$9 sm:$0xff] %v554_v3 }
 0x158   :  { %703 = vst [vmem:[#allocation1 + $0x2] ss:$9 sm:$0xff] %v555_v4 }
 0x159   :  { %704 = vst [vmem:[#allocation1 + $0x3] ss:$9 sm:$0xff] %v556_v5 }
 0x15a   :  { %705 = vst [vmem:[#allocation1 + $0x4] ss:$9 sm:$0xff] %v557_v7 }
 0x15b   :  { %706 = vst [vmem:[#allocation1 + $0x5] ss:$9 sm:$0xff] %v558_v8  ;;  %v819_v8 = vadd.s32 4294967208, %v1055_v42 }
 0x15c   :  { %707 = vst [vmem:[#allocation1 + $0x6] ss:$9 sm:$0xff] %v559_v10  ;;  %v815_v10 = vadd.s32 4294967216, %v1055_v42 }
 0x15d   :  { %708 = vst [vmem:[#allocation1 + $0x7] ss:$9 sm:$0xff] %v560_v11  ;;  %v823_v11 = vadd.s32 4294967200, %v1055_v42 }
 0x164   :  { %v709_v20 = vld [vmem:[#allocation1] sm:$0xff] }
 0x165   :  { %768 = vperm.xlu2 %893, %v709_v20   ;;  %710 = vst [vmem:[#allocation1] ss:$9 sm:$0xff] %v561_v16  ;;  %v751_v57 = vpop.permute.xlu2 %750 }
 0x166   :  { %711 = vst [vmem:[#allocation1 + $0x1] ss:$9 sm:$0xff] %v562_v17  ;;  %v804_v6 = vperm.slane %v751_v57, %v803_v1 }
 0x167   :  { %712 = vst [vmem:[#allocation1 + $0x2] ss:$9 sm:$0xff] %v563_v18 }
 0x168   :  { %713 = vst [vmem:[#allocation1 + $0x3] ss:$9 sm:$0xff] %v564_v19 }
 0x169   :  { %714 = vst [vmem:[#allocation1 + $0x4] ss:$9 sm:$0xff] %v565_v21 }
 0x16a   :  { %715 = vst [vmem:[#allocation1 + $0x5] ss:$9 sm:$0xff] %v566_v22  ;;  %v831_v22 = vadd.s32 4294967184, %v1055_v42 }
 0x16b   :  { %716 = vst [vmem:[#allocation1 + $0x6] ss:$9 sm:$0xff] %v567_v23  ;;  %v827_v23 = vadd.s32 4294967192, %v1055_v42 }
 0x16c   :  { %717 = vst [vmem:[#allocation1 + $0x7] ss:$9 sm:$0xff] %v568_v24 }
 0x16e   :  { %v748_v43 = vpop.permute.xlu1 %747 }
 0x16f   :  { %v800_v63 = vperm.slane %v748_v43, %v799_v58 }
 0x171   :  { %v802_v3 = vsel %vm801_vm9, %v800_v63, %v798_v2 }
 0x172   :  { %v806_v12 = vsel %vm805_vm10, %v804_v6, %v802_v3 }
 0x173   :  { %v718_v30 = vld [vmem:[#allocation1] sm:$0xff] }
 0x174   :  { %771 = vperm.xlu1 %892, %v718_v30   ;;  %719 = vst [vmem:[#allocation1] ss:$9 sm:$0xff] %v569_v26 }
 0x175   :  { %720 = vst [vmem:[#allocation1 + $0x1] ss:$9 sm:$0xff] %v570_v27 }
 0x176   :  { %721 = vst [vmem:[#allocation1 + $0x2] ss:$9 sm:$0xff] %v571_v28  ;;  %v835_v28 = vadd.s32 4294967176, %v1055_v42 }
 0x177   :  { %722 = vst [vmem:[#allocation1 + $0x3] ss:$9 sm:$0xff] %v572_v29 }
 0x178   :  { %723 = vst [vmem:[#allocation1 + $0x4] ss:$9 sm:$0xff] %v573_v31 }
 0x179   :  { %724 = vst [vmem:[#allocation1 + $0x5] ss:$9 sm:$0xff] %v574_v32 }
 0x17a   :  { %725 = vst [vmem:[#allocation1 + $0x6] ss:$9 sm:$0xff] %v575_v33 }
 0x17b   :  { %726 = vst [vmem:[#allocation1 + $0x7] ss:$9 sm:$0xff] %v576_v34  ;;  %v185_v34 = vld [vmem:[#allocation2] sm:$0x1] }
 0x182   :  { %v727_v35 = vld [vmem:[#allocation1] sm:$0xff] }
 0x183   :  { %774 = vperm.xlu0 %894, %v727_v35  }
 0x18c   :  { %v754_v54 = vpop.permute.xlu1 %753 }
 0x18d   :  { %v808_v5 = vperm.slane %v754_v54, %v807_v0 }
 0x18f   :  { %v810_v17 = vsel %vm809_vm11, %v808_v5, %v806_v12 }
 0x192   :  { %v760_v4 = vpop.permute.xlu2 %759 }
 0x193   :  { %v816_v20 = vperm.slane %v760_v4, %v815_v10 }
 0x19b   :  { %v757_v62 = vpop.permute.xlu0 %756 }
 0x19c   :  { %v812_v7 = vperm.slane %v757_v62, %v811_v14 }
 0x19e   :  { %v814_v18 = vsel %vm813_vm12, %v812_v7, %v810_v17 }
 0x19f   :  { %v818_v26 = vsel %vm817_vm13, %v816_v20, %v814_v18 }
 0x1b9   :  { %v763_v15 = vpop.permute.xlu1 %762 }
 0x1ba   :  { %v820_v19 = vperm.slane %v763_v15, %v819_v8 }
 0x1bc   :  { %v822_v27 = vsel %vm821_vm14, %v820_v19, %v818_v26 }
 0x1bf   :  { %v769_v25 = vpop.permute.xlu2 %768 }
 0x1c0   :  { %v828_v31 = vperm.slane %v769_v25, %v827_v23 }
 0x1c8   :  { %v766_v16 = vpop.permute.xlu0 %765 }
 0x1c9   :  { %v824_v21 = vperm.slane %v766_v16, %v823_v11 }
 0x1cb   :  { %v826_v29 = vsel %vm825_vm15, %v824_v21, %v822_v27 }
 0x1cc   :  { %v830_v33 = vsel %vm829_vm0, %v828_v31, %v826_v29 }
 0x1e6   :  { %v772_v24 = vpop.permute.xlu1 %771 }
 0x1e7   :  { %v832_v30 = vperm.slane %v772_v24, %v831_v22 }
 0x1e9   :  { %v834_v36 = vsel %vm833_vm1, %v832_v30, %v830_v33 }
 0x1f5   :  { %v775_v32 = vpop.permute.xlu0 %774 }
 0x1f6   :  { %v836_v35 = vperm.slane %v775_v32, %v835_v28 }
 0x1f8   :  { %v838_v37 = vsel %vm837_vm2, %v836_v35, %v834_v36 }
 0x1f9   :  { %v840_v38 = vadd.f32 %v838_v37, %v185_v34 }
 0x1fb   :  { %841 = vst [vmem:[#allocation2] sm:$0x1] %v840_v38 }
 0x202   :  { %v845_v40 = vld [vmem:[#allocation2] sm:$0x1] }
 0x203   :  { %v848_v41 = vadd.f32 %v847_v39, %v845_v40 }
 0x205   :  { %v849_v42 = vsub.f32 0.0, %v848_v41 }
 0x207   :  { %v850_v43 = vmul.f32 1.442695, %v849_v42 }
 0x209   :  { %895 = vpow2.f32 %v850_v43 }
 0x20f   :  { %v896_v44 = vpop.eup %895 }
 0x210   :  { %v852_v45 = vadd.f32 1.0, %v896_v44 }
 0x212   :  { %897 = vrcp.f32 %v852_v45  ;;  %v864_v49 = vand.u32 2147483648, %v852_v45  ;;  %v862_v51 = vand.u32 2147483647, %v852_v45  ;;  %vm858_vm4 = vweird.f32 %v852_v45 }
 0x214   :  { %v865_v53 = vor.u32 1.1754944e-38, %v864_v49  ;;  %vm863_vm6 = vcmp.eq.f32.partialorder %v862_v51, 8.507059e+37 }
 0x218   :  { %v898_v46 = vpop.eup %897 }
 0x219   :  { %v854_v47 = vmul.f32 %v898_v46, %v852_v45  ;;  %vm859_vm3 = vweird.f32 %v898_v46 }
 0x21a   :  { %vm860_vm5 = vmor %vm858_vm4, %vm859_vm3 }
 0x21b   :  { %v855_v48 = vsub.f32 1.0, %v854_v47 }
 0x21d   :  { %v856_v50 = vmul.f32 %v898_v46, %v855_v48 }
 0x21f   :  { %v857_v52 = vadd.f32 %v898_v46, %v856_v50 }
 0x221   :  { %v861_v54 = vsel %vm860_vm5, %v898_v46, %v857_v52 }
 0x222   :  { %v866_v55 = vsel %vm863_vm6, %v865_v53, %v861_v54 }
 0x223   :  { %868 = vst [vmem:[#allocation7] sm:$0x1] %v866_v55 }
 0x224   :  { %879 = dma.vmem_to_hbm [thread:$0]  %s875_s22, 16, %s877_s2, [#allocation6]  }
 0x225   :  { %949 = dma.done.wait [#allocation6], 16  }
 0x226   :  { %950 = vsyncadd [#allocation6], 4294967280 }
 0x227   :  { %884 = vsyncpa [#allocation5], 1 }
 0x228   :  { %885 = vsyncpa [#allocation6], 1 }

</bundles_post_ra>
